<compile_context>
chip_gen: v5e
topology: v5e:2x2
jax: 0.10.0
libtpu: 0.0.40
codegen_flags: <defaults>
</compile_context>

<pallas_src>
import functools

import jax
import jax.numpy as jnp
from jax import lax
from jax.experimental import pallas as pl
from jax.experimental.pallas import tpu as pltpu


# (fan_in, fan_out) per linear layer: 4 -> 128 -> 64 -> 3
DIMS = [(4, 128), (128, 64), (64, 3)]

# lhs/rhs both contract their minor (feature) dim: (M, K) x (N, K) -> (M, N).
_TRANS_B = (((1,), (1,)), ((), ()))


def _round_up(x, m):
    return ((x + m - 1) // m) * m


def _make_kernel(chunk, n_chunks, act_dtype):
    """Kernel over one (tb, 4) batch tile, sub-chunked along the batch axis."""

    def kernel(x_ref, w1_ref, b1_ref, w2_ref, b2_ref, w3_ref, b3_ref, o_ref):
        # Parameters are VMEM-resident; load once per tile, hoisted out of the
        # chunk loop.  Biases are cast once to the activation dtype.
        w1 = w1_ref[...]                       # (128, 4)  f32
        w2 = w2_ref[...]                       # (64, 128) bf16
        w3 = w3_ref[...]                       # (3, 64)   bf16
        b1 = b1_ref[...].astype(act_dtype)     # (128, 1)
        b2 = b2_ref[...].astype(act_dtype)     # (64, 1)
        b3 = b3_ref[...].astype(act_dtype)     # (3, 1)

        def body(c, carry):
            col = pl.multiple_of(c * chunk, chunk)
            xb = x_ref[pl.ds(col, chunk), :]   # (chunk, 4) f32, native layout

            # Layer 1: contract the size-4 feature dim of both operands ->
            # (128, chunk) feature-major (lane-dense), f32 MXU accumulation.
            # No wrapper or in-kernel transpose pass needed.
            h1 = lax.dot_general(w1, xb, _TRANS_B,
                                 preferred_element_type=jnp.float32)
            h1 = jnp.tanh(h1.astype(act_dtype) + b1)

            # Layer 2: (64, 128) @ (128, chunk) -> (64, chunk)
            h2 = jnp.dot(w2, h1.astype(jnp.bfloat16),
                         preferred_element_type=jnp.float32)
            h2 = jnp.tanh(h2.astype(act_dtype) + b2)

            # Layer 3: (3, 64) @ (64, chunk) -> (3, chunk)
            h3 = jnp.dot(w3, h2.astype(jnp.bfloat16),
                         preferred_element_type=jnp.float32)
            h3 = jnp.tanh(h3.astype(act_dtype) + b3)

            o_ref[:, pl.ds(col, chunk)] = h3.astype(o_ref.dtype)
            return carry

        # Unrolled so the LLO scheduler sees the whole tile; chunking bounds the
        # live vreg working set (no VMEM spills even at tb=1024).
        lax.fori_loop(0, n_chunks, body, 0, unroll=True)

    return kernel


@functools.partial(jax.jit, static_argnames=("tb_max", "chunk_max"))
def irisnet_forward(x, params, *, tb_max=1024, chunk_max=256):
    """x: (B, 4) float32. Returns (B, 3) float32 (torch convention)."""
    B = x.shape[0]

    # Batch tile: multiple of 128 (lane-dense output blocks), large enough to
    # amortize per-grid-step overhead, but capped so the grid has >= 2 steps
    # whenever B allows it (v7x: the "parallel" axis is sharded over 2 TCs).
    tb = min(tb_max, max(128, _round_up(pl.cdiv(B, 2), 128)))
    chunk = chunk_max if tb % chunk_max == 0 else 128
    n_chunks = tb // chunk

    # Only tiny batches (B < tb) get padded (a few KB at most); larger batches
    # are fed natively and the last partial block is handled by Pallas masking.
    b_in = max(B, tb)
    if b_in != B:
        x = jnp.pad(x, ((0, b_in - B), (0, 0)))
    grid = pl.cdiv(b_in, tb)

    # bf16 bias-add + tanh on v6e/v7x (bf16 VPU/EUP); f32 on v5e and older
    # (no bf16 EUP there, bf16 would just insert converts).
    kind = jax.devices()[0].device_kind.lower()
    act_dtype = jnp.bfloat16 if ("v6" in kind or "v7" in kind) else jnp.float32

    w1, b1 = params["w1"], params["b1"]
    w2, b2 = params["w2"], params["b2"]
    w3, b3 = params["w3"], params["b3"]

    def const_spec(shape):
        # Same block every grid step -> fetched once, VMEM-resident throughout.
        return pl.BlockSpec(shape, lambda i: (0, 0))

    flops = 2 * sum(fi * fo for fi, fo in DIMS) * b_in
    transcendentals = sum(fo for _, fo in DIMS) * b_in
    param_bytes = sum(int(p.size) * p.dtype.itemsize
                      for p in (w1, b1, w2, b2, w3, b3))
    bytes_accessed = b_in * 4 * 4 + b_in * 3 * 2 + param_bytes

    out_t = pl.pallas_call(
        _make_kernel(chunk, n_chunks, act_dtype),
        out_shape=jax.ShapeDtypeStruct((3, b_in), jnp.bfloat16),
        grid=(grid,),
        in_specs=[
            pl.BlockSpec((tb, 4), lambda i: (i, 0)),     # x: native layout, streamed
            const_spec(w1.shape), const_spec(b1.shape),  # params: resident
            const_spec(w2.shape), const_spec(b2.shape),
            const_spec(w3.shape), const_spec(b3.shape),
        ],
        out_specs=pl.BlockSpec((3, tb), lambda i: (0, i)),
        compiler_params=pltpu.CompilerParams(
            dimension_semantics=("parallel",)),
        cost_estimate=pl.CostEstimate(
            flops=flops,
            transcendentals=transcendentals,
            bytes_accessed=bytes_accessed),
    )(x, w1, b1, w2, b2, w3, b3)

    # Torch convention (batch, 3) f32.  Callers able to consume the lane-dense
    # (3, B) bf16 slab directly should take `out_t` and skip this tiny relayout.
    return out_t[:, :B].T.astype(jnp.float32)


def init_params(key):
    """Deterministic init mimicking torch.nn.Linear default U[-1/sqrt(fan_in), +].

    Weights stored (out_features, in_features): layer 1 in f32 (trans_b MXU
    operand, trivially small), layers 2-3 in bf16 (MXU operands).  Biases
    stored (out_features, 1) in f32 (cast in-kernel to the activation dtype).
    """
    params = {}
    keys = jax.random.split(key, 2 * len(DIMS))
    for idx, (fan_in, fan_out) in enumerate(DIMS):
        bound = 1.0 / float(fan_in) ** 0.5
        w = jax.random.uniform(keys[2 * idx], (fan_out, fan_in),
                               minval=-bound, maxval=bound, dtype=jnp.float32)
        b = jax.random.uniform(keys[2 * idx + 1], (fan_out, 1),
                               minval=-bound, maxval=bound, dtype=jnp.float32)
        params[f"w{idx + 1}"] = w if idx == 0 else w.astype(jnp.bfloat16)
        params[f"b{idx + 1}"] = b
    return params


def irisnet_reference(x, params):
    """Pure-JAX f32 reference with torch.nn.Linear semantics."""
    h = x
    for idx in range(1, len(DIMS) + 1):
        w = params[f"w{idx}"].astype(jnp.float32)
        b = params[f"b{idx}"].astype(jnp.float32)
        h = jnp.tanh(h @ w.T + b.T)
    return h


# TODO(synk): the PyTorch module's noise_scale != 0 branch references
# self._noise before it is ever assigned (dead code after `return`); the
# default noise_scale=0 forward (plain MLP) is what is implemented here.


if __name__ == "__main__":
    key = jax.random.PRNGKey(0)
    k_params, k_x = jax.random.split(key)
    params = init_params(k_params)

    batch = 8
    x = jax.random.normal(k_x, (batch, 4), dtype=jnp.float32)

    out = jax.block_until_ready(irisnet_forward(x, params))
    ref = irisnet_reference(x, params)

    assert out.shape == (batch, 3), out.shape
    # bf16 MXU operands / bf16 activations+output -> loosened tolerance.
    assert bool(jnp.allclose(out, ref, atol=2e-2, rtol=2e-2)), (
        float(jnp.max(jnp.abs(out - ref))))

    print("KERNEL_OK")
</pallas_src>

<mosaic_0001>
module attributes {stable_mosaic.version = 11 : i64} {
  func.func @kernel(%arg0: i32, %arg1: memref<128x4xf32, #tpu.memory_space<vmem>>, %arg2: memref<128x4xf32, #tpu.memory_space<vmem>>, %arg3: memref<128x1xf32, #tpu.memory_space<vmem>>, %arg4: memref<64x128xbf16, #tpu.memory_space<vmem>>, %arg5: memref<64x1xf32, #tpu.memory_space<vmem>>, %arg6: memref<3x64xbf16, #tpu.memory_space<vmem>>, %arg7: memref<3x1xf32, #tpu.memory_space<vmem>>, %arg8: memref<3x128xbf16, #tpu.memory_space<vmem>>) attributes {dimension_semantics = [#tpu.dimension_semantics<parallel>], iteration_bounds = array<i64: 1>, scalar_prefetch = 0 : i64, scratch_operands = 0 : i64, tpu.core_type = #tpu.core_type<tc>, window_params = [{transform_indices = @transform_0, window_bounds = array<i64: 128, 4>}, {pipeline_mode = #tpu.pipeline_mode<synchronous>, transform_indices = @transform_1, window_bounds = array<i64: 128, 4>}, {pipeline_mode = #tpu.pipeline_mode<synchronous>, transform_indices = @transform_2, window_bounds = array<i64: 128, 1>}, {pipeline_mode = #tpu.pipeline_mode<synchronous>, transform_indices = @transform_3, window_bounds = array<i64: 64, 128>}, {pipeline_mode = #tpu.pipeline_mode<synchronous>, transform_indices = @transform_4, window_bounds = array<i64: 64, 1>}, {pipeline_mode = #tpu.pipeline_mode<synchronous>, transform_indices = @transform_5, window_bounds = array<i64: 3, 64>}, {pipeline_mode = #tpu.pipeline_mode<synchronous>, transform_indices = @transform_6, window_bounds = array<i64: 3, 1>}, {transform_indices = @transform_7, window_bounds = array<i64: 3, 128>}]} {
    %c0 = arith.constant 0 : index
    %c0_0 = arith.constant 0 : index
    %0 = vector.load %arg2[%c0, %c0_0] : memref<128x4xf32, #tpu.memory_space<vmem>>, vector<128x4xf32>
    %c0_1 = arith.constant 0 : index
    %c0_2 = arith.constant 0 : index
    %1 = vector.load %arg4[%c0_1, %c0_2] : memref<64x128xbf16, #tpu.memory_space<vmem>>, vector<64x128xbf16>
    %c0_3 = arith.constant 0 : index
    %c0_4 = arith.constant 0 : index
    %2 = vector.load %arg6[%c0_3, %c0_4] : memref<3x64xbf16, #tpu.memory_space<vmem>>, vector<3x64xbf16>
    %c0_5 = arith.constant 0 : index
    %c0_6 = arith.constant 0 : index
    %3 = vector.load %arg3[%c0_5, %c0_6] : memref<128x1xf32, #tpu.memory_space<vmem>>, vector<128x1xf32>
    %c0_7 = arith.constant 0 : index
    %c0_8 = arith.constant 0 : index
    %4 = vector.load %arg5[%c0_7, %c0_8] : memref<64x1xf32, #tpu.memory_space<vmem>>, vector<64x1xf32>
    %c0_9 = arith.constant 0 : index
    %c0_10 = arith.constant 0 : index
    %5 = vector.load %arg7[%c0_9, %c0_10] : memref<3x1xf32, #tpu.memory_space<vmem>>, vector<3x1xf32>
    %c0_i32 = arith.constant 0 : i32
    %c128_i32 = arith.constant 128 : i32
    %6 = arith.muli %c0_i32, %c128_i32 : i32
    %7 = tpu.assume_multiple %6, 128 : i32
    %8 = arith.index_cast %7 : i32 to index
    %c0_11 = arith.constant 0 : index
    %9 = vector.load %arg1[%8, %c0_11] : memref<128x4xf32, #tpu.memory_space<vmem>>, vector<128x4xf32>
    %cst = arith.constant dense<0.000000e+00> : vector<128x128xf32>
    %10 = tpu.matmul %0, %9, %cst {dimension_numbers = #tpu.dot_dimension_numbers<[1], [1], [0], [0], [0, 0, 1, 0], [], []>} : vector<128x4xf32>, vector<128x4xf32>, vector<128x128xf32> -> vector<128x128xf32>
    %11 = vector.broadcast %3 : vector<128x1xf32> to vector<128x128xf32>
    %12 = arith.addf %10, %11 : vector<128x128xf32>
    %13 = math.tanh %12 : vector<128x128xf32>
    %14 = arith.truncf %13 : vector<128x128xf32> to vector<128x128xbf16>
    %cst_12 = arith.constant dense<0.000000e+00> : vector<64x128xf32>
    %15 = tpu.matmul %1, %14, %cst_12 {dimension_numbers = #tpu.dot_dimension_numbers<[1], [0], [0], [1], [0, 0, 1, 1], [], []>} : vector<64x128xbf16>, vector<128x128xbf16>, vector<64x128xf32> -> vector<64x128xf32>
    %16 = vector.broadcast %4 : vector<64x1xf32> to vector<64x128xf32>
    %17 = arith.addf %15, %16 : vector<64x128xf32>
    %18 = math.tanh %17 : vector<64x128xf32>
    %19 = arith.truncf %18 : vector<64x128xf32> to vector<64x128xbf16>
    %cst_13 = arith.constant dense<0.000000e+00> : vector<3x128xf32>
    %20 = tpu.matmul %2, %19, %cst_13 {dimension_numbers = #tpu.dot_dimension_numbers<[1], [0], [0], [1], [0, 0, 1, 1], [], []>} : vector<3x64xbf16>, vector<64x128xbf16>, vector<3x128xf32> -> vector<3x128xf32>
    %21 = vector.broadcast %5 : vector<3x1xf32> to vector<3x128xf32>
    %22 = arith.addf %20, %21 : vector<3x128xf32>
    %23 = math.tanh %22 : vector<3x128xf32>
    %24 = arith.truncf %23 : vector<3x128xf32> to vector<3x128xbf16>
    %c0_14 = arith.constant 0 : index
    %25 = arith.index_cast %7 : i32 to index
    %26 = vector.load %arg8[%c0_14, %25] : memref<3x128xbf16, #tpu.memory_space<vmem>>, vector<3x128xbf16>
    tpu.vector_store %arg8[%c0_14, %25], %24 {strides = array<i32>} : memref<3x128xbf16, #tpu.memory_space<vmem>>, vector<3x128xbf16>,
    %c1_i32 = arith.constant 1 : i32
    return
  }
  func.func @transform_0(%arg0: i32) -> (i32, i32) {
    %c0_i32 = arith.constant 0 : i32
    %c0_i32_0 = arith.constant 0 : i32
    return %arg0, %c0_i32 : i32, i32
  }
  func.func @transform_1(%arg0: i32) -> (i32, i32) {
    %c0_i32 = arith.constant 0 : i32
    %c0_i32_0 = arith.constant 0 : i32
    %c0_i32_1 = arith.constant 0 : i32
    return %c0_i32, %c0_i32_0 : i32, i32
  }
  func.func @transform_2(%arg0: i32) -> (i32, i32) {
    %c0_i32 = arith.constant 0 : i32
    %c0_i32_0 = arith.constant 0 : i32
    %c0_i32_1 = arith.constant 0 : i32
    return %c0_i32, %c0_i32_0 : i32, i32
  }
  func.func @transform_3(%arg0: i32) -> (i32, i32) {
    %c0_i32 = arith.constant 0 : i32
    %c0_i32_0 = arith.constant 0 : i32
    %c0_i32_1 = arith.constant 0 : i32
    return %c0_i32, %c0_i32_0 : i32, i32
  }
  func.func @transform_4(%arg0: i32) -> (i32, i32) {
    %c0_i32 = arith.constant 0 : i32
    %c0_i32_0 = arith.constant 0 : i32
    %c0_i32_1 = arith.constant 0 : i32
    return %c0_i32, %c0_i32_0 : i32, i32
  }
  func.func @transform_5(%arg0: i32) -> (i32, i32) {
    %c0_i32 = arith.constant 0 : i32
    %c0_i32_0 = arith.constant 0 : i32
    %c0_i32_1 = arith.constant 0 : i32
    return %c0_i32, %c0_i32_0 : i32, i32
  }
  func.func @transform_6(%arg0: i32) -> (i32, i32) {
    %c0_i32 = arith.constant 0 : i32
    %c0_i32_0 = arith.constant 0 : i32
    %c0_i32_1 = arith.constant 0 : i32
    return %c0_i32, %c0_i32_0 : i32, i32
  }
  func.func @transform_7(%arg0: i32) -> (i32, i32) {
    %c0_i32 = arith.constant 0 : i32
    %c0_i32_0 = arith.constant 0 : i32
    return %c0_i32, %arg0 : i32, i32
  }
}

</mosaic_0001>

<bundles_post_ra>
// kernel: irisnet_forward.1
= control target key start
LH: loop header
LB: loop body
LE: loop exit
PB: predicated region body
PF: predicated region fallthrough
CT: control target
= control target key end

     0   :  { %vm173_vm0 = vcmask 31744   ;;  %v637_v5 = vmov 0   ;;  %vm469_vm1 = vcmask 523264   ;;  %vm488_vm2 = vcmask 1041408   ;;  %s940_s0 = inlined_call_operand.vmem [shape: f32[128,4], index: 0, kind: input, shape index: {}]   ;;  %s941_s2 = inlined_call_operand.vmem [shape: f32[128,1], index: 2, kind: input, shape index: {}]   ;;  %s942_s4 = inlined_call_operand.vmem [shape: f32[64,1], index: 4, kind: input, shape index: {}]   ;;  %s943_s1 = inlined_call_operand.vmem [shape: f32[128,4], index: 1, kind: input, shape index: {}]   ;;  %s944_s6 = inlined_call_operand.vmem [shape: f32[3,1], index: 6, kind: input, shape index: {}]   ;;  %s945_s3 = inlined_call_operand.vmem [shape: bf16[64,128], index: 3, kind: input, shape index: {}]   ;;  %s946_s5 = inlined_call_operand.vmem [shape: bf16[3,64], index: 5, kind: input, shape index: {}]   ;;  %s947_s7 = inlined_call_operand.vmem [shape: bf16[3,128], index: 7, kind: output, shape index: {}]  }
   0x1   :  { %v92_v0 = vld [vmem:[%s940_s0 + $0x78] sm:$0xff]  ;;  %v91_v1 = vld [vmem:[%s940_s0 + $0x70] sm:$0xff]  ;;  %v90_v2 = vld [vmem:[%s940_s0 + $0x68] sm:$0xff]  ;;  %584 = vset.pattern.permute.xlu0 %v637_v5  ;;  %585 = vset.pattern.permute.xlu1 %v637_v5  ;;  %vm489_vm3 = vsmask.f32 1280 }
   0x2   :  { %498 = vmatpush.xpose.msk.msra.mxu0 %vm173_vm0, %v92_v0  ;;  %552 = vmatpush.xpose.msk.msra.mxu3 %vm173_vm0, %v92_v0  ;;  %v66_v3 = vld [vmem:[%s941_s2 + $0x70] sm:$0xff]  ;;  %v89_v4 = vld [vmem:[%s940_s0 + $0x60] sm:$0xff]  ;;  %v88_v6 = vld [vmem:[%s940_s0 + $0x58] sm:$0xff] }
   0x3   :  { %551 = vmatpush.xpose.msk.msra.mxu2 %vm173_vm0, %v92_v0  ;;  %165 = vperm.xlu0 %584, %v66_v3   ;;  %v67_v7 = vld [vmem:[%s941_s2 + $0x78] sm:$0xff]  ;;  %v87_v8 = vld [vmem:[%s940_s0 + $0x50] sm:$0xff]  ;;  %v64_v9 = vld [vmem:[%s941_s2 + $0x60] sm:$0xff] }
   0x4   :  { %586 = vset.pattern.permute.xlu2 %v637_v5  ;;  %v86_v10 = vld [vmem:[%s940_s0 + $0x48] sm:$0xff]  ;;  %155 = vperm.xlu1 %585, %v64_v9   ;;  %v60_v11 = vld [vmem:[%s941_s2 + $0x40] sm:$0xff]  ;;  %v84_v13 = vld [vmem:[%s940_s0 + $0x38] sm:$0xff] }
   0x5   :  { %v85_v12 = vld [vmem:[%s940_s0 + $0x40] sm:$0xff]  ;;  %v65_v14 = vld [vmem:[%s941_s2 + $0x68] sm:$0xff]  ;;  %v59_v15 = vld [vmem:[%s941_s2 + $0x38] sm:$0xff] }
   0x6   :  { %499 = vmatpush.xpose.msk.msra.mxu0 %vm173_vm0, %v91_v1  ;;  %554 = vmatpush.xpose.msk.msra.mxu3 %vm173_vm0, %v91_v1  ;;  %v83_v16 = vld [vmem:[%s940_s0 + $0x30] sm:$0xff]  ;;  %v82_v17 = vld [vmem:[%s940_s0 + $0x28] sm:$0xff]  ;;  %v81_v20 = vld [vmem:[%s940_s0 + $0x20] sm:$0xff] }
   0x7   :  { %553 = vmatpush.xpose.msk.msra.mxu2 %vm173_vm0, %v91_v1  ;;  %v61_v18 = vld [vmem:[%s941_s2 + $0x48] sm:$0xff]  ;;  %v54_v19 = vld [vmem:[%s941_s2 + $0x10] sm:$0xff]  ;;  %v80_v21 = vld [vmem:[%s940_s0 + $0x18] sm:$0xff] }
   0x8   :  { %v56_v22 = vld [vmem:[%s941_s2 + $0x20] sm:$0xff]  ;;  %v62_v23 = vld [vmem:[%s941_s2 + $0x50] sm:$0xff]  ;;  %v53_v24 = vld [vmem:[%s941_s2 + $0x8] sm:$0xff] }
   0x9   :  { %v79_v25 = vld [vmem:[%s940_s0 + $0x10] sm:$0xff]  ;;  %145 = vperm.xlu2 %586, %v62_v23   ;;  %v78_v26 = vld [vmem:[%s940_s0 + $0x8] sm:$0xff]  ;;  %v55_v27 = vld [vmem:[%s941_s2 + $0x18] sm:$0xff] }
   0xa   :  { %500 = vmatpush.xpose.msk.msra.mxu0 %vm173_vm0, %v90_v2  ;;  %556 = vmatpush.xpose.msk.msra.mxu3 %vm173_vm0, %v90_v2  ;;  %v63_v28 = vld [vmem:[%s941_s2 + $0x58] sm:$0xff]  ;;  %v72_v29 = vld [vmem:[%s942_s4 + $0x20] sm:$0xff]  ;;  %v37_v32 = vld [vmem:[%s943_s1 + $0x50] sm:$0xff] }
   0xb   :  { %555 = vmatpush.xpose.msk.msra.mxu2 %vm173_vm0, %v90_v2  ;;  %170 = vperm.xlu0 %584, %v67_v7   ;;  %v77_v30 = vld [vmem:[%s940_s0] sm:$0xff]  ;;  %v33_v33 = vld [vmem:[%s943_s1 + $0x30] sm:$0xff]  ;;  %v71_v36 = vld [vmem:[%s942_s4 + $0x18] sm:$0xff] }
   0xc   :  { %160 = vperm.xlu1 %585, %v65_v14   ;;  %v27_v31 = vld [vmem:[%s943_s1] sm:$0xff]  ;;  %v74_v34 = vld [vmem:[%s942_s4 + $0x30] sm:$0xff]  ;;  %v28_v37 = vld [vmem:[%s943_s1 + $0x8] sm:$0xff] }
   0xd   :  { %v58_v35 = vld [vmem:[%s941_s2 + $0x30] sm:$0xff]  ;;  %v38_v38 = vld [vmem:[%s943_s1 + $0x58] sm:$0xff]  ;;  %v73_v40 = vld [vmem:[%s942_s4 + $0x28] sm:$0xff] }
   0xe   :  { %501 = vmatpush.xpose.msk.msra.mxu0 %vm173_vm0, %v89_v4  ;;  %558 = vmatpush.xpose.msk.msra.mxu3 %vm173_vm0, %v89_v4  ;;  %v34_v39 = vld [vmem:[%s943_s1 + $0x38] sm:$0xff]  ;;  %v57_v41 = vld [vmem:[%s941_s2 + $0x28] sm:$0xff]  ;;  %v76_v42 = vld [vmem:[%s944_s6] sm:$0x7] }
   0xf   :  { %557 = vmatpush.xpose.msk.msra.mxu2 %vm173_vm0, %v89_v4  ;;  %v29_v43 = vld [vmem:[%s943_s1 + $0x10] sm:$0xff]  ;;  %v39_v44 = vld [vmem:[%s943_s1 + $0x60] sm:$0xff]  ;;  %v30_v48 = vld [vmem:[%s943_s1 + $0x18] sm:$0xff] }
  0x10   :  { %v35_v45 = vld [vmem:[%s943_s1 + $0x40] sm:$0xff]  ;;  %v40_v49 = vld [vmem:[%s943_s1 + $0x68] sm:$0xff]  ;;  %v75_v51 = vld [vmem:[%s942_s4 + $0x38] sm:$0xff] }
  0x11   :  { %150 = vperm.xlu2 %586, %v63_v28   ;;  %v68_v46 = vld [vmem:[%s942_s4] sm:$0xff]  ;;  %v36_v50 = vld [vmem:[%s943_s1 + $0x48] sm:$0xff]  ;;  %v41_v53 = vld [vmem:[%s943_s1 + $0x70] sm:$0xff] }
  0x12   :  { %502 = vmatpush.xpose.msk.msra.mxu0 %vm173_vm0, %v88_v6  ;;  %560 = vmatpush.xpose.msk.msra.mxu3 %vm173_vm0, %v88_v6  ;;  %v52_v47 = vld [vmem:[%s941_s2] sm:$0xff]  ;;  %v70_v54 = vld [vmem:[%s942_s4 + $0x10] sm:$0xff]  ;;  %v32_v55 = vld [vmem:[%s943_s1 + $0x28] sm:$0xff] }
  0x13   :  { %559 = vmatpush.xpose.msk.msra.mxu2 %vm173_vm0, %v88_v6  ;;  %135 = vperm.xlu0 %584, %v60_v11   ;;  %v31_v52 = vld [vmem:[%s943_s1 + $0x20] sm:$0xff]  ;;  %v42_v56 = vld [vmem:[%s943_s1 + $0x78] sm:$0xff]  ;;  %v69_v57 = vld [vmem:[%s942_s4 + $0x8] sm:$0xff] }
  0x14   :  { %140 = vperm.xlu1 %585, %v61_v18   ;;  %vm490_vm4 = vmand %vm488_vm2, %vm489_vm3 }
  0x16   :  { %503 = vmatpush.xpose.msk.msra.mxu0 %vm173_vm0, %v87_v8  ;;  %562 = vmatpush.xpose.msk.msra.mxu3 %vm173_vm0, %v87_v8 }
  0x17   :  { %561 = vmatpush.xpose.msk.msra.mxu2 %vm173_vm0, %v87_v8 }
  0x19   :  { %125 = vperm.xlu2 %586, %v58_v35  }
  0x1a   :  { %504 = vmatpush.xpose.msk.msra.mxu0 %vm173_vm0, %v86_v10  ;;  %564 = vmatpush.xpose.msk.msra.mxu3 %vm173_vm0, %v86_v10 }
  0x1b   :  { %563 = vmatpush.xpose.msk.msra.mxu2 %vm173_vm0, %v86_v10  ;;  %130 = vperm.xlu0 %584, %v59_v15  }
  0x1c   :  { %115 = vperm.xlu1 %585, %v56_v22  }
  0x1e   :  { %505 = vmatpush.xpose.msk.msra.mxu0 %vm173_vm0, %v85_v12  ;;  %566 = vmatpush.xpose.msk.msra.mxu3 %vm173_vm0, %v85_v12 }
  0x1f   :  { %565 = vmatpush.xpose.msk.msra.mxu2 %vm173_vm0, %v85_v12 }
  0x21   :  { %120 = vperm.xlu2 %586, %v57_v41  }
  0x22   :  { %506 = vmatpush.xpose.msk.msra.mxu0 %vm173_vm0, %v84_v13  ;;  %568 = vmatpush.xpose.msk.msra.mxu3 %vm173_vm0, %v84_v13 }
  0x23   :  { %567 = vmatpush.xpose.msk.msra.mxu2 %vm173_vm0, %v84_v13  ;;  %105 = vperm.xlu0 %584, %v54_v19  }
  0x24   :  { %110 = vperm.xlu1 %585, %v55_v27  }
  0x26   :  { %507 = vmatpush.xpose.msk.msra.mxu0 %vm173_vm0, %v83_v16  ;;  %570 = vmatpush.xpose.msk.msra.mxu3 %vm173_vm0, %v83_v16 }
  0x27   :  { %569 = vmatpush.xpose.msk.msra.mxu2 %vm173_vm0, %v83_v16 }
  0x29   :  { %95 = vperm.xlu2 %586, %v52_v47  }
  0x2a   :  { %508 = vmatpush.xpose.msk.msra.mxu0 %vm173_vm0, %v82_v17  ;;  %572 = vmatpush.xpose.msk.msra.mxu3 %vm173_vm0, %v82_v17 }
  0x2b   :  { %571 = vmatpush.xpose.msk.msra.mxu2 %vm173_vm0, %v82_v17  ;;  %100 = vperm.xlu0 %584, %v53_v24  }
  0x2c   :  { %391 = vperm.xlu1 %585, %v74_v34  }
  0x2e   :  { %509 = vmatpush.xpose.msk.msra.mxu0 %vm173_vm0, %v81_v20  ;;  %574 = vmatpush.xpose.msk.msra.mxu3 %vm173_vm0, %v81_v20 }
  0x2f   :  { %573 = vmatpush.xpose.msk.msra.mxu2 %vm173_vm0, %v81_v20 }
  0x31   :  { %396 = vperm.xlu2 %586, %v75_v51  }
  0x32   :  { %510 = vmatpush.xpose.msk.msra.mxu0 %vm173_vm0, %v80_v21  ;;  %576 = vmatpush.xpose.msk.msra.mxu3 %vm173_vm0, %v80_v21 }
  0x33   :  { %575 = vmatpush.xpose.msk.msra.mxu2 %vm173_vm0, %v80_v21  ;;  %381 = vperm.xlu0 %584, %v72_v29  }
  0x34   :  { %386 = vperm.xlu1 %585, %v73_v40  }
  0x36   :  { %511 = vmatpush.xpose.msk.msra.mxu0 %vm173_vm0, %v79_v25  ;;  %578 = vmatpush.xpose.msk.msra.mxu3 %vm173_vm0, %v79_v25 }
  0x37   :  { %577 = vmatpush.xpose.msk.msra.mxu2 %vm173_vm0, %v79_v25 }
  0x39   :  { %371 = vperm.xlu2 %586, %v70_v54  }
  0x3a   :  { %512 = vmatpush.xpose.msk.msra.mxu0 %vm173_vm0, %v78_v26  ;;  %580 = vmatpush.xpose.msk.msra.mxu3 %vm173_vm0, %v78_v26 }
  0x3b   :  { %579 = vmatpush.xpose.msk.msra.mxu2 %vm173_vm0, %v78_v26  ;;  %376 = vperm.xlu0 %584, %v71_v36  }
  0x3c   :  { %361 = vperm.xlu1 %585, %v68_v46  }
  0x3e   :  { %513 = vmatpush.xpose.msk.msra.mxu0 %vm173_vm0, %v77_v30  ;;  %582 = vmatpush.xpose.msk.msra.mxu3 %vm173_vm0, %v77_v30 }
  0x3f   :  { %581 = vmatpush.xpose.msk.msra.mxu2 %vm173_vm0, %v77_v30 }
  0x41   :  { %514 = vmatmul.msk.f32.vlgmr.msra.gmra.mxu0 %vm173_vm0, %v27_v31  ;;  %524 = vmatmul.msk.f32.vlgmr.msra.gmra.mxu3 %vm173_vm0, %v37_v32 }
  0x42   :  { %520 = vmatmul.msk.f32.vlgmr.msra.gmra.mxu2 %vm173_vm0, %v33_v33  ;;  %366 = vperm.xlu2 %586, %v69_v57  }
  0x43   :  { %466 = vperm.xlu0 %584, %v76_v42  }
  0x49   :  { %515 = vmatmul.msk.f32.gmra.mxu0 %vm173_vm0, %v28_v37  ;;  %525 = vmatmul.msk.f32.gmra.mxu3 %vm173_vm0, %v38_v38 }
  0x4a   :  { %521 = vmatmul.msk.f32.gmra.mxu2 %vm173_vm0, %v34_v39 }
  0x51   :  { %516 = vmatmul.msk.f32.gmra.mxu0 %vm173_vm0, %v29_v43  ;;  %526 = vmatmul.msk.f32.gmra.mxu3 %vm173_vm0, %v39_v44 }
  0x52   :  { %522 = vmatmul.msk.f32.gmra.mxu2 %vm173_vm0, %v35_v45 }
  0x59   :  { %517 = vmatmul.msk.f32.gmra.mxu0 %vm173_vm0, %v30_v48  ;;  %527 = vmatmul.msk.f32.gmra.mxu3 %vm173_vm0, %v40_v49 }
  0x5a   :  { %523 = vmatmul.msk.f32.gmra.mxu2 %vm173_vm0, %v36_v50 }
  0x61   :  { %518 = vmatmul.msk.f32.gmra.mxu0 %vm173_vm0, %v31_v52  ;;  %528 = vmatmul.msk.f32.gmra.mxu3 %vm173_vm0, %v41_v53 }
  0x63   :  { %v146_v3 = vpop.permute.xlu2 %145 }
  0x69   :  { %519 = vmatmul.msk.f32.gmra.mxu0 %vm173_vm0, %v32_v55  ;;  %529 = vmatmul.msk.f32.gmra.mxu3 %vm173_vm0, %v42_v56 }
  0x6b   :  { %v151_v9 = vpop.permute.xlu2 %150 }
  0x73   :  { %v126_v18 = vpop.permute.xlu2 %125 }
  0x75   :  { %v166_v61 = vpop.permute.xlu0 %165 }
  0x76   :  { %v156_v1 = vpop.permute.xlu1 %155 }
  0x7b   :  { %v121_v34 = vpop.permute.xlu2 %120 }
  0x7d   :  { %v171_v2 = vpop.permute.xlu0 %170 }
  0x7e   :  { %v161_v7 = vpop.permute.xlu1 %160 }
  0x83   :  { %v96_v52 = vpop.permute.xlu2 %95 }
  0x85   :  { %v136_v10 = vpop.permute.xlu0 %135 }
  0x86   :  { %v141_v14 = vpop.permute.xlu1 %140 }
  0x8d   :  { %v131_v20 = vpop.permute.xlu0 %130 }
  0x8e   :  { %v116_v29 = vpop.permute.xlu1 %115 }
  0x95   :  { %v106_v36 = vpop.permute.xlu0 %105 }
  0x96   :  { %v111_v46 = vpop.permute.xlu1 %110 }
  0x9d   :  { %v101_v53 = vpop.permute.xlu0 %100 }
  0xbe   :  { %v913_v59 = vpop.f32.mrf.mxu0 }
  0xbf   :  { %v288_v54 = vadd.f32 %v913_v59, %v96_v52  ;;  %v547_v59 = vld [vmem:[%s945_s3] sm:$0xff] }
  0xc4   :  { %v317_v58 = vpop.f32.mrf.mxu3 }
  0xc5   :  { %v305_v63 = vpop.f32.mrf.mxu2  ;;  %v318_v24 = vadd.f32 %v317_v58, %v146_v3 }
  0xc6   :  { %v915_v62 = vpop.f32.mrf.mxu0  ;;  %v306_v32 = vadd.f32 %v305_v63, %v126_v18 }
  0xc7   :  { %v291_v55 = vadd.f32 %v915_v62, %v101_v53  ;;  %v548_v62 = vld [vmem:[%s945_s3 + $0x8] sm:$0xff] }
  0xcc   :  { %v320_v60 = vpop.f32.mrf.mxu3 }
  0xcd   :  { %v308_v6 = vpop.f32.mrf.mxu2  ;;  %v321_v22 = vadd.f32 %v320_v60, %v151_v9 }
  0xce   :  { %v293_v4 = vpop.f32.mrf.mxu0  ;;  %v309_v35 = vadd.f32 %v308_v6, %v131_v20 }
  0xcf   :  { %v294_v47 = vadd.f32 %v293_v4, %v106_v36  ;;  %v549_v4 = vld [vmem:[%s945_s3 + $0x10] sm:$0xff] }
  0xd4   :  { %v323_v0 = vpop.f32.mrf.mxu3 }
  0xd5   :  { %v311_v12 = vpop.f32.mrf.mxu2  ;;  %v324_v19 = vadd.f32 %v323_v0, %v156_v1 }
  0xd6   :  { %v296_v11 = vpop.f32.mrf.mxu0  ;;  %v312_v26 = vadd.f32 %v311_v12, %v136_v10  ;;  %v397_v12 = vpop.permute.xlu2 %396 }
  0xd7   :  { %v297_v48 = vadd.f32 %v296_v11, %v111_v46 }
  0xdc   :  { %v326_v5 = vpop.f32.mrf.mxu3 }
  0xdd   :  { %v327_v16 = vadd.f32 %v326_v5, %v161_v7  ;;  %v314_v23 = vpop.f32.mrf.mxu2  ;;  %v550_v5 = vld [vmem:[%s945_s3 + $0x18] sm:$0xff] }
  0xde   :  { %v299_v21 = vpop.f32.mrf.mxu0  ;;  %v315_v28 = vadd.f32 %v314_v23, %v141_v14 }
  0xdf   :  { %v300_v45 = vadd.f32 %v299_v21, %v116_v29 }
  0xe4   :  { %v329_v8 = vpop.f32.mrf.mxu3 }
  0xe5   :  { %v330_v13 = vadd.f32 %v329_v8, %v166_v61 }
  0xe6   :  { %v302_v37 = vpop.f32.mrf.mxu0 }
  0xe7   :  { %587 = vtanh.f32 %v330_v13  ;;  %v303_v41 = vadd.f32 %v302_v37, %v121_v34  ;;  %v392_v13 = vpop.permute.xlu1 %391 }
  0xec   :  { %v332_v15 = vpop.f32.mrf.mxu3 }
  0xed   :  { %v333_v17 = vadd.f32 %v332_v15, %v171_v2  ;;  %v588_v25 = vpop.eup %587  ;;  %v382_v15 = vpop.permute.xlu0 %381 }
  0xef   :  { %589 = vtanh.f32 %v333_v17  ;;  %v387_v18 = vpop.permute.xlu1 %386 }
  0xf0   :  { %591 = vtanh.f32 %v327_v16  ;;  %v372_v16 = vpop.permute.xlu2 %371 }
  0xf1   :  { %593 = vtanh.f32 %v324_v19 }
  0xf2   :  { %595 = vtanh.f32 %v321_v22 }
  0xf3   :  { %597 = vtanh.f32 %v318_v24 }
  0xf4   :  { %599 = vtanh.f32 %v312_v26 }
  0xf5   :  { %v590_v27 = vpop.eup %589  ;;  %601 = vtanh.f32 %v315_v28  ;;  %v377_v23 = vpop.permute.xlu0 %376 }
  0xf6   :  { %v358_v30 = vpack.c.bf16 %v590_v27, %v588_v25  ;;  %v592_v31 = vpop.eup %591  ;;  %603 = vtanh.f32 %v306_v32 }
  0xf7   :  { %v594_v33 = vpop.eup %593  ;;  %605 = vtanh.f32 %v309_v35 }
  0xf8   :  { %423 = vmatpush.bf16.msra.mxu1 %v358_v30  ;;  %v357_v38 = vpack.c.bf16 %v592_v31, %v594_v33  ;;  %v596_v39 = vpop.eup %595  ;;  %607 = vtanh.f32 %v303_v41  ;;  %v367_v27 = vpop.permute.xlu2 %366 }
  0xf9   :  { %v598_v40 = vpop.eup %597  ;;  %609 = vtanh.f32 %v300_v45  ;;  %v362_v30 = vpop.permute.xlu1 %361 }
  0xfa   :  { %v600_v42 = vpop.eup %599  ;;  %v356_v43 = vpack.c.bf16 %v596_v39, %v598_v40  ;;  %611 = vtanh.f32 %v294_v47 }
  0xfb   :  { %v602_v44 = vpop.eup %601  ;;  %613 = vtanh.f32 %v297_v48  ;;  %v491_v48 = vld [vmem:[%s947_s7] sm:$0x3] }
  0xfc   :  { %424 = vmatpush.bf16.msra.mxu1 %v357_v38  ;;  %v604_v49 = vpop.eup %603  ;;  %v355_v50 = vpack.c.bf16 %v602_v44, %v600_v42  ;;  %615 = vtanh.f32 %v288_v54  ;;  %v51_v42 = vld [vmem:[%s946_s5] sm:$0x3] }
  0xfd   :  { %v606_v51 = vpop.eup %605  ;;  %617 = vtanh.f32 %v291_v55 }
  0xfe   :  { %v354_v56 = vpack.c.bf16 %v606_v51, %v604_v49  ;;  %v608_v57 = vpop.eup %607 }
  0xff   :  { %v610_v58 = vpop.eup %609 }
 0x100   :  { %425 = vmatpush.bf16.msra.mxu1 %v356_v43  ;;  %v612_v60 = vpop.eup %611  ;;  %v353_v61 = vpack.c.bf16 %v608_v57, %v610_v58  ;;  %v467_v43 = vpop.permute.xlu0 %466 }
 0x101   :  { %v614_v63 = vpop.eup %613 }
 0x102   :  { %v616_v0 = vpop.eup %615  ;;  %v352_v1 = vpack.c.bf16 %v614_v63, %v612_v60 }
 0x103   :  { %v618_v2 = vpop.eup %617 }
 0x104   :  { %426 = vmatpush.bf16.msra.mxu1 %v355_v50  ;;  %v351_v3 = vpack.c.bf16 %v618_v2, %v616_v0 }
 0x108   :  { %427 = vmatpush.bf16.msra.mxu1 %v354_v56 }
 0x10c   :  { %428 = vmatpush.bf16.msra.mxu1 %v353_v61 }
 0x110   :  { %429 = vmatpush.bf16.msra.mxu1 %v352_v1 }
 0x114   :  { %430 = vmatpush.bf16.msra.mxu1 %v351_v3 }
 0x117   :  { %431 = vmatmul.bf16.vlgmr.msra.gmra.mxu1 %v547_v59 }
 0x127   :  { %436 = vmatmul.bf16.gmra.mxu1 %v548_v62 }
 0x137   :  { %441 = vmatmul.bf16.gmra.mxu1 %v549_v4 }
 0x147   :  { %446 = vmatmul.bf16.gmra.mxu1 %v550_v5 }
 0x194   :  { %v432_v6 = vpop.f32.mrf.mxu1 }
 0x195   :  { %v433_v33 = vadd.f32 %v432_v6, %v362_v30 }
 0x19c   :  { %v434_v7 = vpop.f32.mrf.mxu1 }
 0x19d   :  { %v435_v29 = vadd.f32 %v434_v7, %v367_v27 }
 0x1a4   :  { %v437_v8 = vpop.f32.mrf.mxu1 }
 0x1a5   :  { %v438_v25 = vadd.f32 %v437_v8, %v372_v16 }
 0x1ac   :  { %v439_v9 = vpop.f32.mrf.mxu1 }
 0x1ad   :  { %v440_v24 = vadd.f32 %v439_v9, %v377_v23 }
 0x1b4   :  { %v442_v10 = vpop.f32.mrf.mxu1 }
 0x1b5   :  { %v443_v22 = vadd.f32 %v442_v10, %v382_v15 }
 0x1bc   :  { %v444_v11 = vpop.f32.mrf.mxu1 }
 0x1bd   :  { %v445_v20 = vadd.f32 %v444_v11, %v387_v18 }
 0x1c4   :  { %v447_v14 = vpop.f32.mrf.mxu1 }
 0x1c5   :  { %v448_v17 = vadd.f32 %v447_v14, %v392_v13 }
 0x1c7   :  { %619 = vtanh.f32 %v448_v17 }
 0x1cc   :  { %v449_v19 = vpop.f32.mrf.mxu1 }
 0x1cd   :  { %v450_v21 = vadd.f32 %v449_v19, %v397_v12  ;;  %v620_v26 = vpop.eup %619 }
 0x1cf   :  { %621 = vtanh.f32 %v450_v21 }
 0x1d0   :  { %623 = vtanh.f32 %v445_v20 }
 0x1d1   :  { %625 = vtanh.f32 %v443_v22 }
 0x1d2   :  { %627 = vtanh.f32 %v440_v24 }
 0x1d3   :  { %629 = vtanh.f32 %v438_v25 }
 0x1d4   :  { %631 = vtanh.f32 %v435_v29 }
 0x1d5   :  { %v622_v28 = vpop.eup %621  ;;  %633 = vtanh.f32 %v433_v33 }
 0x1d6   :  { %v463_v31 = vpack.c.bf16 %v622_v28, %v620_v26  ;;  %v624_v32 = vpop.eup %623 }
 0x1d7   :  { %v626_v34 = vpop.eup %625 }
 0x1d8   :  { %477 = vmatpush.bf16.msrb.mxu2 %v463_v31  ;;  %v462_v35 = vpack.c.bf16 %v624_v32, %v626_v34  ;;  %v628_v36 = vpop.eup %627 }
 0x1d9   :  { %v630_v37 = vpop.eup %629 }
 0x1da   :  { %v461_v38 = vpack.c.bf16 %v628_v36, %v630_v37  ;;  %v632_v39 = vpop.eup %631 }
 0x1db   :  { %v634_v40 = vpop.eup %633 }
 0x1dc   :  { %478 = vmatpush.bf16.msrb.mxu2 %v462_v35  ;;  %v460_v41 = vpack.c.bf16 %v632_v39, %v634_v40 }
 0x1e0   :  { %479 = vmatpush.bf16.msrb.mxu2 %v461_v38 }
 0x1e4   :  { %480 = vmatpush.bf16.msrb.mxu2 %v460_v41 }
 0x1e7   :  { %546 = vmatmul.msk.bf16.vlgmr.msrb.gmra.mxu2 %vm469_vm1, %v51_v42 }
 0x26a   :  { %v482_v44 = vpop.f32.mrf.mxu2 }
 0x26b   :  { %v483_v45 = vadd.f32 %v482_v44, %v467_v43 }
 0x26d   :  { %635 = vtanh.f32 %v483_v45 }
 0x272   :  { %v484_v46 = vpop.f32.mrf.mxu2 }
 0x273   :  { %v636_v47 = vpop.eup %635 }
 0x274   :  { %v487_v49 = vpack.c.bf16 %v636_v47, %v636_v47 }
 0x276   :  { %v492_v50 = vsel %vm490_vm4, %v487_v49, %v491_v48 }
 0x277   :  { %493 = vst [vmem:[%s947_s7] sm:$0x3] %v492_v50 }

</bundles_post_ra>
